<compile_context>
chip_gen: v7x
topology: tpu7x:2x2x1
jax: 0.10.0
libtpu: 0.0.40
codegen_flags: <defaults>
</compile_context>

<pallas_src>
import functools

import numpy as np
import jax
import jax.numpy as jnp
from jax import lax
from jax.experimental import pallas as pl
from jax.experimental.pallas import tpu as pltpu


# ----------------------------------------------------------------------------
# Kernel 1: fused re-blur + weighted-SSE reductions (one grid step per image).
# ----------------------------------------------------------------------------
def _loss_kernel(ker_ref,                        # SMEM (B, kH*kW): flipped PSF taps
                 target_ref, blur0_ref, w_ref,   # VMEM (1, H, W)
                 padded_ref,                     # VMEM (1, Hp, Wp): reflect-padded pred
                 mse_ref, reblur_ref,            # VMEM (1, 1) accumulators
                 *, H, W, kH, kW, pad_h, pad_w):
    b = pl.program_id(0)

    @pl.when(b == 0)
    def _init():
        mse_ref[...] = jnp.zeros_like(mse_ref)
        reblur_ref[...] = jnp.zeros_like(reblur_ref)

    def _sum2d(x):                               # (H, W) -> (1, 1), stays vector-shaped
        return jnp.sum(jnp.sum(x, axis=1, keepdims=True), axis=0, keepdims=True)

    target = target_ref[0]
    weights = w_ref[0]
    # The un-padded prediction is the interior of the reflect-padded image.
    pred = padded_ref[0, pad_h:pad_h + H, pad_w:pad_w + W]

    diff = pred - target
    mse_part = _sum2d(diff * diff * weights)

    # Re-blur: out[y, x] = sum_{dy,dx} k_flip[dy, dx] * padded[y + dy, x + dx]
    def row_body(dy, acc):
        for dx in range(kW):                     # static -> unrolled; taps from SMEM
            kv = ker_ref[b, dy * kW + dx]
            acc = acc + kv * padded_ref[0, pl.ds(dy, H), pl.ds(dx, W)]
        return acc

    reblurred = lax.fori_loop(0, kH, row_body, jnp.zeros((H, W), jnp.float32))

    rdiff = reblurred - blur0_ref[0]
    reblur_part = _sum2d(rdiff * rdiff * weights)

    mse_ref[...] += mse_part
    reblur_ref[...] += reblur_part


# ----------------------------------------------------------------------------
# Kernel 2: iterative moment-matching ellipticity (one grid step per image set,
# grid = 2 -> [pred batch, target batch]).
# ----------------------------------------------------------------------------
def _ellip_kernel(img_ref, e1_ref, e2_ref, *, B, H, W, counter_target, conv_thr):
    imgs = img_ref[0]                                              # (B, H, W)

    X = lax.broadcasted_iota(jnp.int32, (B, H, W), 2).astype(jnp.float32) - (W / 2.0 - 0.5)
    Y = lax.broadcasted_iota(jnp.int32, (B, H, W), 1).astype(jnp.float32) - (H / 2.0 - 0.5)

    def bsum(a):                                                   # (B,H,W) -> (B,1,1)
        return jnp.sum(jnp.sum(a, axis=2, keepdims=True), axis=1, keepdims=True)

    total = bsum(imgs)
    image_area = float(H * W)

    ones = jnp.ones((B, 1, 1), jnp.float32)
    zeros = jnp.zeros((B, 1, 1), jnp.float32)

    init = (jnp.array(0, jnp.int32), jnp.array(0, jnp.int32),      # iteration, done
            2.0 * ones, 2.0 * ones, zeros,                         # alphax, alphay, alphaxy
            zeros, zeros, zeros,                                   # mux, muy, back
            4.0 * ones, 4.0 * ones,                                # prev_sigxx, prev_sigyy
            zeros, zeros)                                          # e1, e2

    def cond(state):
        it, done = state[0], state[1]
        return jnp.logical_and(it < counter_target, done == 0)

    def body(state):
        (it, _, alphax, alphay, alphaxy, mux, muy, back,
         prev_sigxx, prev_sigyy, _, _) = state

        alphax = jnp.clip(alphax, 0.5, 20.0)
        alphay = jnp.clip(alphay, 0.5, 20.0)
        alphaxy = jnp.clip(alphaxy, -10.0, 10.0)

        Xc = X - mux
        Yc = Y - muy
        alpha_denom = jnp.maximum(alphax * alphay, 1e-8)
        alpha_ratio = jnp.clip(alphaxy / alpha_denom, -0.95, 0.95)
        arb_const = jnp.maximum(2.0 * (1.0 - alpha_ratio ** 2), 1e-8)
        sqrt_term = jnp.maximum(1.0 - alpha_ratio ** 2, 1e-8)
        A = 1.0 / (2.0 * np.pi * alpha_denom * jnp.sqrt(sqrt_term))
        A = jnp.clip(A, 1e-10, 1e10)
        alphax_sq = jnp.maximum(alphax ** 2, 1e-8)
        alphay_sq = jnp.maximum(alphay ** 2, 1e-8)

        exp_term1 = Xc ** 2 / (arb_const * alphax_sq)
        exp_term2 = Yc ** 2 / (arb_const * alphay_sq)
        exp_term3 = (2.0 * alphaxy * Xc * Yc) / (arb_const * alphax_sq * alphay_sq)
        exp_term = jnp.clip(exp_term1 + exp_term2 - exp_term3, 0.0, 30.0)

        k = A * jnp.exp(-exp_term)
        k = jnp.where(jnp.isnan(k), 0.0, k)
        k = jnp.where(jnp.isinf(k), 0.0, k)

        img1 = imgs - back
        ik = img1 * k
        t1 = bsum(X * Y * ik)
        t2 = bsum(ik)
        t3 = bsum(X * ik)
        t4 = bsum(Y * ik)
        t5 = bsum(X * X * ik)
        t6 = bsum(Y * Y * ik)
        t7 = bsum(k * k)

        t2_safe = jnp.maximum(jnp.abs(t2), 1e-6)
        t7_safe = jnp.maximum(t7, 1e-6)
        flux_calc = t2 / t7_safe
        new_back = jnp.clip((total - flux_calc) / image_area, -1.0, 1.0)
        new_mux = jnp.clip(t3 / t2_safe, -W / 2.0, W / 2.0)
        new_muy = jnp.clip(t4 / t2_safe, -H / 2.0, H / 2.0)

        sigxx = t5 / t2_safe - (t3 / t2_safe) ** 2
        sigyy = t6 / t2_safe - (t4 / t2_safe) ** 2
        sigxy = t1 / t2_safe - t3 * t4 / (t2_safe * t2_safe)
        sigxx = jnp.clip(sigxx, 0.25, 100.0)
        sigyy = jnp.clip(sigyy, 0.25, 100.0)
        sigxy = jnp.clip(sigxy, -50.0, 50.0)

        new_alphax = jnp.sqrt(jnp.clip(sigxx * 2.0, 1.0, 400.0))
        new_alphay = jnp.sqrt(jnp.clip(sigyy * 2.0, 1.0, 400.0))
        new_alphaxy = jnp.clip(2.0 * sigxy, -20.0, 20.0)

        denom = jnp.maximum(sigxx + sigyy, 1e-6)
        e1 = jnp.clip((sigxx - sigyy) / denom, -0.95, 0.95)
        e2 = jnp.clip(2.0 * sigxy / denom, -0.95, 0.95)
        e1 = jnp.where(jnp.isnan(e1), 0.0, e1)
        e2 = jnp.where(jnp.isnan(e2), 0.0, e2)
        new_alphax = jnp.where(jnp.isnan(new_alphax), 2.0, new_alphax)
        new_alphay = jnp.where(jnp.isnan(new_alphay), 2.0, new_alphay)
        new_alphaxy = jnp.where(jnp.isnan(new_alphaxy), 0.0, new_alphaxy)

        # Batch-global convergence check -> same early break as the PyTorch loop.
        diff = jnp.maximum(jnp.abs(sigxx - prev_sigxx), jnp.abs(sigyy - prev_sigyy))
        converged = jnp.logical_and(it > 0, jnp.max(diff) < conv_thr)
        done = converged.astype(jnp.int32)

        return (it + 1, done, new_alphax, new_alphay, new_alphaxy,
                new_mux, new_muy, new_back, sigxx, sigyy, e1, e2)

    final = lax.while_loop(cond, body, init)
    e1_ref[0] = final[10]
    e2_ref[0] = final[11]


# ----------------------------------------------------------------------------
# Wrapper: PSFLoss.forward
# ----------------------------------------------------------------------------
def psf_loss(pred, target, blurred, kernel, weights, epoch=0, ellip_weight=0.01,
             counter_target=40, convergence_threshold=0.01):
    pred = pred.astype(jnp.float32)
    target = target.astype(jnp.float32)
    blurred = blurred.astype(jnp.float32)
    kernel = kernel.astype(jnp.float32)
    weights = weights.astype(jnp.float32)

    B, _, H, W = pred.shape
    kH, kW = kernel.shape[2], kernel.shape[3]
    pad_h = (kH - 1) // 2
    pad_h_extra = 1 if kH % 2 == 0 else 0
    pad_w = (kW - 1) // 2
    pad_w_extra = 1 if kW % 2 == 0 else 0
    Hp = H + kH - 1
    Wp = W + kW - 1

    pred_hw = pred[:, 0]
    target_hw = target[:, 0]
    blur0_hw = blurred[:, 0]
    weights_hw = weights[:, 0]

    # Reflect-pad (same asymmetric padding as the PyTorch code) and flip the
    # PSF (F.conv2d is cross-correlation, so flipped kernel == true convolution).
    padded = jnp.pad(
        pred_hw,
        ((0, 0), (pad_h, pad_h + pad_h_extra), (pad_w, pad_w + pad_w_extra)),
        mode="reflect")
    ker_flip = jnp.flip(kernel[:, 0], axis=(1, 2)).reshape(B, kH * kW)

    loss_kernel = functools.partial(_loss_kernel, H=H, W=W, kH=kH, kW=kW,
                                    pad_h=pad_h, pad_w=pad_w)
    mse_sum, reblur_sum = pl.pallas_call(
        loss_kernel,
        out_shape=(jax.ShapeDtypeStruct((1, 1), jnp.float32),
                   jax.ShapeDtypeStruct((1, 1), jnp.float32)),
        grid_spec=pltpu.PrefetchScalarGridSpec(
            num_scalar_prefetch=1,                       # PSF taps -> SMEM
            grid=(B,),
            in_specs=[
                pl.BlockSpec((1, H, W), lambda b, k: (b, 0, 0)),    # target
                pl.BlockSpec((1, H, W), lambda b, k: (b, 0, 0)),    # blurred[:, 0]
                pl.BlockSpec((1, H, W), lambda b, k: (b, 0, 0)),    # weights
                pl.BlockSpec((1, Hp, Wp), lambda b, k: (b, 0, 0)),  # padded pred
            ],
            out_specs=(pl.BlockSpec((1, 1), lambda b, k: (0, 0)),
                       pl.BlockSpec((1, 1), lambda b, k: (0, 0))),
        ),
        compiler_params=pltpu.CompilerParams(
            dimension_semantics=("arbitrary",)),          # accumulator outputs
    )(ker_flip, target_hw, blur0_hw, weights_hw, padded)

    n_pix = float(B * 1 * H * W)
    weighted_mse = mse_sum[0, 0] / n_pix
    reblur_loss = reblur_sum[0, 0] / n_pix

    if ellip_weight > 0:
        stacked = jnp.stack([pred_hw, target_hw], axis=0)           # (2, B, H, W)
        ellip_kernel = functools.partial(
            _ellip_kernel, B=B, H=H, W=W,
            counter_target=counter_target, conv_thr=convergence_threshold)
        e1_all, e2_all = pl.pallas_call(
            ellip_kernel,
            out_shape=(jax.ShapeDtypeStruct((2, B, 1, 1), jnp.float32),
                       jax.ShapeDtypeStruct((2, B, 1, 1), jnp.float32)),
            grid_spec=pltpu.PrefetchScalarGridSpec(
                num_scalar_prefetch=0,
                grid=(2,),
                in_specs=[pl.BlockSpec((1, B, H, W), lambda g: (g, 0, 0, 0))],
                out_specs=(pl.BlockSpec((1, B, 1, 1), lambda g: (g, 0, 0, 0)),
                           pl.BlockSpec((1, B, 1, 1), lambda g: (g, 0, 0, 0))),
            ),
            compiler_params=pltpu.CompilerParams(
                dimension_semantics=("parallel",)),       # pred / target independent
        )(stacked)
        e1_pred, e1_true = e1_all[0, :, 0, 0], e1_all[1, :, 0, 0]
        e2_pred, e2_true = e2_all[0, :, 0, 0], e2_all[1, :, 0, 0]
        ellip_loss = jnp.mean((e1_pred - e1_true) ** 2 + (e2_pred - e2_true) ** 2)
        ellip_w = ellip_weight + 0.1 * min(epoch, 4)
    else:
        ellip_loss = jnp.array(0.0, jnp.float32)
        ellip_w = 0.0

    total_loss = 100.0 * weighted_mse + 100.0 * reblur_loss + ellip_w * ellip_loss
    return {"total_loss": total_loss, "weighted_mse": weighted_mse,
            "reblur_loss": reblur_loss, "ellip_loss": ellip_loss}


# ----------------------------------------------------------------------------
# Plain-JAX references mirroring the PyTorch code (for verification only).
# ----------------------------------------------------------------------------
def _reference_blur(images, kernels):
    B, _, H, W = images.shape
    _, _, kH, kW = kernels.shape
    kflip = jnp.flip(kernels, axis=(2, 3))
    pad_h = (kH - 1) // 2
    pad_h_extra = 1 if kH % 2 == 0 else 0
    pad_w = (kW - 1) // 2
    pad_w_extra = 1 if kW % 2 == 0 else 0
    padded = jnp.pad(images, ((0, 0), (0, 0),
                              (pad_h, pad_h + pad_h_extra),
                              (pad_w, pad_w + pad_w_extra)), mode="reflect")
    x = padded.reshape(1, B, H + kH - 1, W + kW - 1)
    out = lax.conv_general_dilated(
        x, kflip, window_strides=(1, 1), padding="VALID",
        dimension_numbers=("NCHW", "OIHW", "NCHW"),
        feature_group_count=B, precision=lax.Precision.HIGHEST)
    return jnp.transpose(out, (1, 0, 2, 3))


def _reference_ellipticity(images, counter_target=40, convergence_threshold=0.01):
    B, H, W = images.shape
    y = jnp.linspace(0.0, H - 1, H) - H / 2.0 + 0.5
    x = jnp.linspace(0.0, W - 1, W) - W / 2.0 + 0.5
    Y, X = jnp.meshgrid(y, x, indexing="ij")
    X = jnp.broadcast_to(X[None], (B, H, W))
    Y = jnp.broadcast_to(Y[None], (B, H, W))
    alphax = jnp.full((B,), 2.0)
    alphay = jnp.full((B,), 2.0)
    alphaxy = jnp.zeros((B,))
    mux = jnp.zeros((B,))
    muy = jnp.zeros((B,))
    back = jnp.zeros((B,))
    prev_sigxx = jnp.full((B,), 4.0)
    prev_sigyy = jnp.full((B,), 4.0)
    e1 = jnp.zeros((B,))
    e2 = jnp.zeros((B,))
    for iteration in range(counter_target):
        alphax = jnp.clip(alphax, 0.5, 20.0)
        alphay = jnp.clip(alphay, 0.5, 20.0)
        alphaxy = jnp.clip(alphaxy, -10.0, 10.0)
        Xc = X - mux[:, None, None]
        Yc = Y - muy[:, None, None]
        alpha_denom = jnp.maximum(alphax * alphay, 1e-8)
        alpha_ratio = jnp.clip(alphaxy / alpha_denom, -0.95, 0.95)
        arb_const = jnp.maximum(2.0 * (1.0 - alpha_ratio ** 2), 1e-8)
        sqrt_term = jnp.maximum(1.0 - alpha_ratio ** 2, 1e-8)
        A = 1.0 / (2.0 * np.pi * alpha_denom * jnp.sqrt(sqrt_term))
        A = jnp.clip(A, 1e-10, 1e10)
        alphax_sq = jnp.maximum(alphax ** 2, 1e-8)
        alphay_sq = jnp.maximum(alphay ** 2, 1e-8)
        exp_term1 = Xc ** 2 / (arb_const * alphax_sq)[:, None, None]
        exp_term2 = Yc ** 2 / (arb_const * alphay_sq)[:, None, None]
        exp_term3 = (2 * alphaxy[:, None, None] * Xc * Yc /
                     (arb_const * alphax_sq * alphay_sq)[:, None, None])
        exp_term = jnp.clip(exp_term1 + exp_term2 - exp_term3, 0.0, 30.0)
        k = A[:, None, None] * jnp.exp(-exp_term)
        k = jnp.where(jnp.isnan(k), 0.0, k)
        k = jnp.where(jnp.isinf(k), 0.0, k)
        img1 = images - back[:, None, None]
        t1 = jnp.sum(X * Y * img1 * k, axis=(1, 2))
        t2 = jnp.sum(img1 * k, axis=(1, 2))
        t3 = jnp.sum(X * img1 * k, axis=(1, 2))
        t4 = jnp.sum(Y * img1 * k, axis=(1, 2))
        t5 = jnp.sum(X * X * img1 * k, axis=(1, 2))
        t6 = jnp.sum(Y * Y * img1 * k, axis=(1, 2))
        t7 = jnp.sum(k * k, axis=(1, 2))
        t2_safe = jnp.maximum(jnp.abs(t2), 1e-6)
        t7_safe = jnp.maximum(t7, 1e-6)
        flux_calc = t2 / t7_safe
        total = jnp.sum(images, axis=(1, 2))
        image_area = H * W
        new_back = jnp.clip((total - flux_calc) / image_area, -1.0, 1.0)
        new_mux = jnp.clip(t3 / t2_safe, -W / 2, W / 2)
        new_muy = jnp.clip(t4 / t2_safe, -H / 2, H / 2)
        sigxx = t5 / t2_safe - (t3 / t2_safe) ** 2
        sigyy = t6 / t2_safe - (t4 / t2_safe) ** 2
        sigxy = t1 / t2_safe - t3 * t4 / (t2_safe * t2_safe)
        sigxx = jnp.clip(sigxx, 0.25, 100.0)
        sigyy = jnp.clip(sigyy, 0.25, 100.0)
        sigxy = jnp.clip(sigxy, -50.0, 50.0)
        new_alphax = jnp.sqrt(jnp.clip(sigxx * 2.0, 1.0, 400.0))
        new_alphay = jnp.sqrt(jnp.clip(sigyy * 2.0, 1.0, 400.0))
        new_alphaxy = jnp.clip(2.0 * sigxy, -20.0, 20.0)
        denominator = jnp.maximum(sigxx + sigyy, 1e-6)
        e1 = jnp.clip((sigxx - sigyy) / denominator, -0.95, 0.95)
        e2 = jnp.clip(2.0 * sigxy / denominator, -0.95, 0.95)
        e1 = jnp.where(jnp.isnan(e1), 0.0, e1)
        e2 = jnp.where(jnp.isnan(e2), 0.0, e2)
        new_alphax = jnp.where(jnp.isnan(new_alphax), 2.0, new_alphax)
        new_alphay = jnp.where(jnp.isnan(new_alphay), 2.0, new_alphay)
        new_alphaxy = jnp.where(jnp.isnan(new_alphaxy), 0.0, new_alphaxy)
        if iteration > 0:
            sigxx_conv = bool(jnp.max(jnp.abs(sigxx - prev_sigxx)) < convergence_threshold)
            sigyy_conv = bool(jnp.max(jnp.abs(sigyy - prev_sigyy)) < convergence_threshold)
            if sigxx_conv and sigyy_conv:
                break
        alphax, alphay, alphaxy = new_alphax, new_alphay, new_alphaxy
        mux, muy, back = new_mux, new_muy, new_back
        prev_sigxx, prev_sigyy = sigxx, sigyy
    return e1, e2


def reference_psf_loss(pred, target, blurred, kernel, weights, epoch=0, ellip_weight=0.01):
    weighted_mse = jnp.mean((pred - target) ** 2 * weights)
    original_blurred = blurred[:, 0:1]
    reblurred = _reference_blur(pred, kernel)
    reblur_loss = jnp.mean((reblurred - original_blurred) ** 2 * weights)
    if ellip_weight > 0:
        e1_pred, e2_pred = _reference_ellipticity(pred[:, 0])
        e1_true, e2_true = _reference_ellipticity(target[:, 0])
        ellip_loss = jnp.mean((e1_pred - e1_true) ** 2 + (e2_pred - e2_true) ** 2)
        ellip_w = ellip_weight + 0.1 * min(epoch, 4)
    else:
        ellip_loss = jnp.array(0.0)
        ellip_w = 0.0
    total_loss = 100 * weighted_mse + 100 * reblur_loss + ellip_w * ellip_loss
    return {"total_loss": total_loss, "weighted_mse": weighted_mse,
            "reblur_loss": reblur_loss, "ellip_loss": ellip_loss}


if __name__ == "__main__":
    B, H, W = 2, 32, 32
    kH, kW = 8, 8   # even-sized PSF (like the module's 48x48) -> asymmetric reflect pad

    key = jax.random.PRNGKey(0)
    k_noise_p, k_noise_t, k_blur, k_ker, k_w = jax.random.split(key, 5)

    # Elliptical Gaussian "galaxies" + small noise so the moment iteration is
    # well conditioned (mirrors the astronomical use case).
    y = jnp.arange(H, dtype=jnp.float32) - H / 2.0 + 0.5
    x = jnp.arange(W, dtype=jnp.float32) - W / 2.0 + 0.5
    Y, X = jnp.meshgrid(y, x, indexing="ij")

    def blob(sx, sy, rho, amp):
        q = (X / sx) ** 2 + (Y / sy) ** 2 - 2.0 * rho * (X / sx) * (Y / sy)
        return amp * jnp.exp(-0.5 * q / (1.0 - rho ** 2))

    target_imgs = jnp.stack([blob(3.0, 2.2, 0.15, 1.0), blob(2.4, 3.1, -0.2, 0.8)])
    pred_imgs = jnp.stack([blob(2.8, 2.4, 0.05, 0.95), blob(2.6, 2.9, -0.1, 0.85)])
    target = (target_imgs + 0.01 * jax.random.normal(k_noise_t, (B, H, W)))[:, None]
    pred = (pred_imgs + 0.01 * jax.random.normal(k_noise_p, (B, H, W)))[:, None]

    # Per-image PSF kernels (positive, normalized).
    ky = jnp.arange(kH, dtype=jnp.float32) - kH / 2.0 + 0.5
    kx = jnp.arange(kW, dtype=jnp.float32) - kW / 2.0 + 0.5
    KY, KX = jnp.meshgrid(ky, kx, indexing="ij")
    base = jnp.exp(-(KX ** 2 + KY ** 2) / (2.0 * 1.5 ** 2))
    kern = base[None] * (1.0 + 0.2 * jax.random.uniform(k_ker, (B, 1, 1)))
    kern = kern + 0.02 * jax.random.uniform(k_ker, (B, kH, kW))
    kern = (kern / jnp.sum(kern, axis=(1, 2), keepdims=True))[:, None]   # (B,1,kH,kW)

    blurred = 0.1 * jax.random.normal(k_blur, (B, 3, H, W), jnp.float32)
    blurred = blurred.at[:, 0:1].add(_reference_blur(target, kern))
    weights = 0.5 + jax.random.uniform(k_w, (B, 1, H, W), jnp.float32)

    out = psf_loss(pred, target, blurred, kern, weights, epoch=2)
    out = jax.tree_util.tree_map(jax.block_until_ready, out)

    ref = reference_psf_loss(pred, target, blurred, kern, weights, epoch=2)

    for name in ("weighted_mse", "reblur_loss", "ellip_loss", "total_loss"):
        np.testing.assert_allclose(np.asarray(out[name]), np.asarray(ref[name]),
                                   rtol=5e-4, atol=1e-6)

    print("KERNEL_OK")
</pallas_src>

<mosaic_0001>
module attributes {stable_mosaic.version = 11 : i64} {
  func.func @_loss_kernel(%arg0: i32, %arg1: memref<2x64xf32, #tpu.memory_space<smem>>, %arg2: memref<1x32x32xf32, #tpu.memory_space<vmem>>, %arg3: memref<1x32x32xf32, #tpu.memory_space<vmem>>, %arg4: memref<1x32x32xf32, #tpu.memory_space<vmem>>, %arg5: memref<1x39x39xf32, #tpu.memory_space<vmem>>, %arg6: memref<1x1xf32, #tpu.memory_space<vmem>>, %arg7: memref<1x1xf32, #tpu.memory_space<vmem>>) attributes {dimension_semantics = [#tpu.dimension_semantics<arbitrary>], iteration_bounds = array<i64: 2>, scalar_prefetch = 1 : i64, scratch_operands = 0 : i64, tpu.core_type = #tpu.core_type<tc>, window_params = [{transform_indices = @transform_0, window_bounds = array<i64: 1, 32, 32>}, {transform_indices = @transform_1, window_bounds = array<i64: 1, 32, 32>}, {transform_indices = @transform_2, window_bounds = array<i64: 1, 32, 32>}, {transform_indices = @transform_3, window_bounds = array<i64: 1, 39, 39>}, {pipeline_mode = #tpu.pipeline_mode<synchronous>, transform_indices = @transform_4, window_bounds = array<i64: 1, 1>}, {pipeline_mode = #tpu.pipeline_mode<synchronous>, transform_indices = @transform_5, window_bounds = array<i64: 1, 1>}]} {
    %c0_i32 = arith.constant 0 : i32
    %0 = arith.cmpi eq, %arg0, %c0_i32 : i32
    %1 = arith.extui %0 : i1 to i32
    %c0_i32_0 = arith.constant 0 : i32
    %2 = arith.cmpi ne, %1, %c0_i32_0 : i32
    scf.if %2 {
      %cst_25 = arith.constant 0.000000e+00 : f32
      %34 = vector.broadcast %cst_25 : f32 to vector<1x1xf32>
      %c0_26 = arith.constant 0 : index
      %c0_27 = arith.constant 0 : index
      %35 = vector.load %arg6[%c0_26, %c0_27] : memref<1x1xf32, #tpu.memory_space<vmem>>, vector<1x1xf32>
      tpu.vector_store %arg6[%c0_26, %c0_27], %34 {strides = array<i32>} : memref<1x1xf32, #tpu.memory_space<vmem>>, vector<1x1xf32>,
      %cst_28 = arith.constant 0.000000e+00 : f32
      %36 = vector.broadcast %cst_28 : f32 to vector<1x1xf32>
      %c0_29 = arith.constant 0 : index
      %c0_30 = arith.constant 0 : index
      %37 = vector.load %arg7[%c0_29, %c0_30] : memref<1x1xf32, #tpu.memory_space<vmem>>, vector<1x1xf32>
      tpu.vector_store %arg7[%c0_29, %c0_30], %36 {strides = array<i32>} : memref<1x1xf32, #tpu.memory_space<vmem>>, vector<1x1xf32>,
    } else {
    }
    %c0 = arith.constant 0 : index
    %c0_1 = arith.constant 0 : index
    %c0_2 = arith.constant 0 : index
    %3 = vector.load %arg2[%c0, %c0_1, %c0_2] : memref<1x32x32xf32, #tpu.memory_space<vmem>>, vector<1x32x32xf32>
    %4 = vector.shape_cast %3 : vector<1x32x32xf32> to vector<32x32xf32>
    %c0_3 = arith.constant 0 : index
    %c0_4 = arith.constant 0 : index
    %c0_5 = arith.constant 0 : index
    %5 = vector.load %arg4[%c0_3, %c0_4, %c0_5] : memref<1x32x32xf32, #tpu.memory_space<vmem>>, vector<1x32x32xf32>
    %6 = vector.shape_cast %5 : vector<1x32x32xf32> to vector<32x32xf32>
    %c0_6 = arith.constant 0 : index
    %c3 = arith.constant 3 : index
    %c3_7 = arith.constant 3 : index
    %7 = vector.load %arg5[%c0_6, %c3, %c3_7] : memref<1x39x39xf32, #tpu.memory_space<vmem>>, vector<1x32x32xf32>
    %8 = vector.shape_cast %7 : vector<1x32x32xf32> to vector<32x32xf32>
    %9 = arith.subf %8, %4 : vector<32x32xf32>
    %10 = arith.mulf %9, %9 : vector<32x32xf32>
    %11 = arith.mulf %10, %6 : vector<32x32xf32>
    %cst = arith.constant dense<0.000000e+00> : vector<32xf32>
    %12 = vector.multi_reduction <add>, %11, %cst [1] : vector<32x32xf32> to vector<32xf32>
    %13 = vector.shape_cast %12 : vector<32xf32> to vector<32x1xf32>
    %cst_8 = arith.constant dense<0.000000e+00> : vector<1xf32>
    %14 = vector.multi_reduction <add>, %13, %cst_8 [0] : vector<32x1xf32> to vector<1xf32>
    %15 = vector.shape_cast %14 : vector<1xf32> to vector<1x1xf32>
    %cst_9 = arith.constant 0.000000e+00 : f32
    %16 = vector.broadcast %cst_9 : f32 to vector<32x32xf32>
    %c0_i32_10 = arith.constant 0 : i32
    %c8_i32 = arith.constant 8 : i32
    %17 = arith.addi %c0_i32_10, %c8_i32 : i32
    %c1_i32 = arith.constant 1 : i32
    %18 = scf.for %arg8 = %c0_i32_10 to %17 step %c1_i32 iter_args(%arg9 = %16) -> (vector<32x32xf32>)  : i32 {
      %c8_i32_25 = arith.constant 8 : i32
      %34 = arith.muli %arg8, %c8_i32_25 : i32
      %c0_i32_26 = arith.constant 0 : i32
      %35 = arith.addi %34, %c0_i32_26 : i32
      %36 = arith.index_cast %arg0 : i32 to index
      %37 = arith.index_cast %35 : i32 to index
      %38 = memref.load %arg1[%36, %37] : memref<2x64xf32, #tpu.memory_space<smem>>
      %c0_27 = arith.constant 0 : index
      %39 = arith.index_cast %arg8 : i32 to index
      %c0_28 = arith.constant 0 : index
      %40 = vector.load %arg5[%c0_27, %39, %c0_28] : memref<1x39x39xf32, #tpu.memory_space<vmem>>, vector<1x32x32xf32>
      %41 = vector.shape_cast %40 : vector<1x32x32xf32> to vector<32x32xf32>
      %42 = vector.broadcast %38 : f32 to vector<32x32xf32>
      %43 = arith.mulf %42, %41 : vector<32x32xf32>
      %44 = arith.addf %arg9, %43 : vector<32x32xf32>
      %c8_i32_29 = arith.constant 8 : i32
      %45 = arith.muli %arg8, %c8_i32_29 : i32
      %c1_i32_30 = arith.constant 1 : i32
      %46 = arith.addi %45, %c1_i32_30 : i32
      %47 = arith.index_cast %arg0 : i32 to index
      %48 = arith.index_cast %46 : i32 to index
      %49 = memref.load %arg1[%47, %48] : memref<2x64xf32, #tpu.memory_space<smem>>
      %c0_31 = arith.constant 0 : index
      %50 = arith.index_cast %arg8 : i32 to index
      %c1 = arith.constant 1 : index
      %51 = vector.load %arg5[%c0_31, %50, %c1] : memref<1x39x39xf32, #tpu.memory_space<vmem>>, vector<1x32x32xf32>
      %52 = vector.shape_cast %51 : vector<1x32x32xf32> to vector<32x32xf32>
      %53 = vector.broadcast %49 : f32 to vector<32x32xf32>
      %54 = arith.mulf %53, %52 : vector<32x32xf32>
      %55 = arith.addf %44, %54 : vector<32x32xf32>
      %c8_i32_32 = arith.constant 8 : i32
      %56 = arith.muli %arg8, %c8_i32_32 : i32
      %c2_i32 = arith.constant 2 : i32
      %57 = arith.addi %56, %c2_i32 : i32
      %58 = arith.index_cast %arg0 : i32 to index
      %59 = arith.index_cast %57 : i32 to index
      %60 = memref.load %arg1[%58, %59] : memref<2x64xf32, #tpu.memory_space<smem>>
      %c0_33 = arith.constant 0 : index
      %61 = arith.index_cast %arg8 : i32 to index
      %c2 = arith.constant 2 : index
      %62 = vector.load %arg5[%c0_33, %61, %c2] : memref<1x39x39xf32, #tpu.memory_space<vmem>>, vector<1x32x32xf32>
      %63 = vector.shape_cast %62 : vector<1x32x32xf32> to vector<32x32xf32>
      %64 = vector.broadcast %60 : f32 to vector<32x32xf32>
      %65 = arith.mulf %64, %63 : vector<32x32xf32>
      %66 = arith.addf %55, %65 : vector<32x32xf32>
      %c8_i32_34 = arith.constant 8 : i32
      %67 = arith.muli %arg8, %c8_i32_34 : i32
      %c3_i32 = arith.constant 3 : i32
      %68 = arith.addi %67, %c3_i32 : i32
      %69 = arith.index_cast %arg0 : i32 to index
      %70 = arith.index_cast %68 : i32 to index
      %71 = memref.load %arg1[%69, %70] : memref<2x64xf32, #tpu.memory_space<smem>>
      %c0_35 = arith.constant 0 : index
      %72 = arith.index_cast %arg8 : i32 to index
      %c3_36 = arith.constant 3 : index
      %73 = vector.load %arg5[%c0_35, %72, %c3_36] : memref<1x39x39xf32, #tpu.memory_space<vmem>>, vector<1x32x32xf32>
      %74 = vector.shape_cast %73 : vector<1x32x32xf32> to vector<32x32xf32>
      %75 = vector.broadcast %71 : f32 to vector<32x32xf32>
      %76 = arith.mulf %75, %74 : vector<32x32xf32>
      %77 = arith.addf %66, %76 : vector<32x32xf32>
      %c8_i32_37 = arith.constant 8 : i32
      %78 = arith.muli %arg8, %c8_i32_37 : i32
      %c4_i32 = arith.constant 4 : i32
      %79 = arith.addi %78, %c4_i32 : i32
      %80 = arith.index_cast %arg0 : i32 to index
      %81 = arith.index_cast %79 : i32 to index
      %82 = memref.load %arg1[%80, %81] : memref<2x64xf32, #tpu.memory_space<smem>>
      %c0_38 = arith.constant 0 : index
      %83 = arith.index_cast %arg8 : i32 to index
      %c4 = arith.constant 4 : index
      %84 = vector.load %arg5[%c0_38, %83, %c4] : memref<1x39x39xf32, #tpu.memory_space<vmem>>, vector<1x32x32xf32>
      %85 = vector.shape_cast %84 : vector<1x32x32xf32> to vector<32x32xf32>
      %86 = vector.broadcast %82 : f32 to vector<32x32xf32>
      %87 = arith.mulf %86, %85 : vector<32x32xf32>
      %88 = arith.addf %77, %87 : vector<32x32xf32>
      %c8_i32_39 = arith.constant 8 : i32
      %89 = arith.muli %arg8, %c8_i32_39 : i32
      %c5_i32 = arith.constant 5 : i32
      %90 = arith.addi %89, %c5_i32 : i32
      %91 = arith.index_cast %arg0 : i32 to index
      %92 = arith.index_cast %90 : i32 to index
      %93 = memref.load %arg1[%91, %92] : memref<2x64xf32, #tpu.memory_space<smem>>
      %c0_40 = arith.constant 0 : index
      %94 = arith.index_cast %arg8 : i32 to index
      %c5 = arith.constant 5 : index
      %95 = vector.load %arg5[%c0_40, %94, %c5] : memref<1x39x39xf32, #tpu.memory_space<vmem>>, vector<1x32x32xf32>
      %96 = vector.shape_cast %95 : vector<1x32x32xf32> to vector<32x32xf32>
      %97 = vector.broadcast %93 : f32 to vector<32x32xf32>
      %98 = arith.mulf %97, %96 : vector<32x32xf32>
      %99 = arith.addf %88, %98 : vector<32x32xf32>
      %c8_i32_41 = arith.constant 8 : i32
      %100 = arith.muli %arg8, %c8_i32_41 : i32
      %c6_i32 = arith.constant 6 : i32
      %101 = arith.addi %100, %c6_i32 : i32
      %102 = arith.index_cast %arg0 : i32 to index
      %103 = arith.index_cast %101 : i32 to index
      %104 = memref.load %arg1[%102, %103] : memref<2x64xf32, #tpu.memory_space<smem>>
      %c0_42 = arith.constant 0 : index
      %105 = arith.index_cast %arg8 : i32 to index
      %c6 = arith.constant 6 : index
      %106 = vector.load %arg5[%c0_42, %105, %c6] : memref<1x39x39xf32, #tpu.memory_space<vmem>>, vector<1x32x32xf32>
      %107 = vector.shape_cast %106 : vector<1x32x32xf32> to vector<32x32xf32>
      %108 = vector.broadcast %104 : f32 to vector<32x32xf32>
      %109 = arith.mulf %108, %107 : vector<32x32xf32>
      %110 = arith.addf %99, %109 : vector<32x32xf32>
      %c8_i32_43 = arith.constant 8 : i32
      %111 = arith.muli %arg8, %c8_i32_43 : i32
      %c7_i32 = arith.constant 7 : i32
      %112 = arith.addi %111, %c7_i32 : i32
      %113 = arith.index_cast %arg0 : i32 to index
      %114 = arith.index_cast %112 : i32 to index
      %115 = memref.load %arg1[%113, %114] : memref<2x64xf32, #tpu.memory_space<smem>>
      %c0_44 = arith.constant 0 : index
      %116 = arith.index_cast %arg8 : i32 to index
      %c7 = arith.constant 7 : index
      %117 = vector.load %arg5[%c0_44, %116, %c7] : memref<1x39x39xf32, #tpu.memory_space<vmem>>, vector<1x32x32xf32>
      %118 = vector.shape_cast %117 : vector<1x32x32xf32> to vector<32x32xf32>
      %119 = vector.broadcast %115 : f32 to vector<32x32xf32>
      %120 = arith.mulf %119, %118 : vector<32x32xf32>
      %121 = arith.addf %110, %120 : vector<32x32xf32>
      scf.yield %121 : vector<32x32xf32>
    }
    %c8_i32_11 = arith.constant 8 : i32
    %c0_12 = arith.constant 0 : index
    %c0_13 = arith.constant 0 : index
    %c0_14 = arith.constant 0 : index
    %19 = vector.load %arg3[%c0_12, %c0_13, %c0_14] : memref<1x32x32xf32, #tpu.memory_space<vmem>>, vector<1x32x32xf32>
    %20 = vector.shape_cast %19 : vector<1x32x32xf32> to vector<32x32xf32>
    %21 = arith.subf %18, %20 : vector<32x32xf32>
    %22 = arith.mulf %21, %21 : vector<32x32xf32>
    %23 = arith.mulf %22, %6 : vector<32x32xf32>
    %cst_15 = arith.constant dense<0.000000e+00> : vector<32xf32>
    %24 = vector.multi_reduction <add>, %23, %cst_15 [1] : vector<32x32xf32> to vector<32xf32>
    %25 = vector.shape_cast %24 : vector<32xf32> to vector<32x1xf32>
    %cst_16 = arith.constant dense<0.000000e+00> : vector<1xf32>
    %26 = vector.multi_reduction <add>, %25, %cst_16 [0] : vector<32x1xf32> to vector<1xf32>
    %27 = vector.shape_cast %26 : vector<1xf32> to vector<1x1xf32>
    %c0_17 = arith.constant 0 : index
    %c0_18 = arith.constant 0 : index
    %28 = vector.load %arg6[%c0_17, %c0_18] : memref<1x1xf32, #tpu.memory_space<vmem>>, vector<1x1xf32>
    %29 = arith.addf %28, %15 : vector<1x1xf32>
    %c0_19 = arith.constant 0 : index
    %c0_20 = arith.constant 0 : index
    %30 = vector.load %arg6[%c0_19, %c0_20] : memref<1x1xf32, #tpu.memory_space<vmem>>, vector<1x1xf32>
    tpu.vector_store %arg6[%c0_19, %c0_20], %29 {strides = array<i32>} : memref<1x1xf32, #tpu.memory_space<vmem>>, vector<1x1xf32>,
    %c0_21 = arith.constant 0 : index
    %c0_22 = arith.constant 0 : index
    %31 = vector.load %arg7[%c0_21, %c0_22] : memref<1x1xf32, #tpu.memory_space<vmem>>, vector<1x1xf32>
    %32 = arith.addf %31, %27 : vector<1x1xf32>
    %c0_23 = arith.constant 0 : index
    %c0_24 = arith.constant 0 : index
    %33 = vector.load %arg7[%c0_23, %c0_24] : memref<1x1xf32, #tpu.memory_space<vmem>>, vector<1x1xf32>
    tpu.vector_store %arg7[%c0_23, %c0_24], %32 {strides = array<i32>} : memref<1x1xf32, #tpu.memory_space<vmem>>, vector<1x1xf32>,
    return
  }
  func.func @transform_0(%arg0: i32, %arg1: memref<2x64xf32, #tpu.memory_space<smem>>) -> (i32, i32, i32) {
    %c0_i32 = arith.constant 0 : i32
    %c0_i32_0 = arith.constant 0 : i32
    %c0_i32_1 = arith.constant 0 : i32
    return %arg0, %c0_i32, %c0_i32_0 : i32, i32, i32
  }
  func.func @transform_1(%arg0: i32, %arg1: memref<2x64xf32, #tpu.memory_space<smem>>) -> (i32, i32, i32) {
    %c0_i32 = arith.constant 0 : i32
    %c0_i32_0 = arith.constant 0 : i32
    %c0_i32_1 = arith.constant 0 : i32
    return %arg0, %c0_i32, %c0_i32_0 : i32, i32, i32
  }
  func.func @transform_2(%arg0: i32, %arg1: memref<2x64xf32, #tpu.memory_space<smem>>) -> (i32, i32, i32) {
    %c0_i32 = arith.constant 0 : i32
    %c0_i32_0 = arith.constant 0 : i32
    %c0_i32_1 = arith.constant 0 : i32
    return %arg0, %c0_i32, %c0_i32_0 : i32, i32, i32
  }
  func.func @transform_3(%arg0: i32, %arg1: memref<2x64xf32, #tpu.memory_space<smem>>) -> (i32, i32, i32) {
    %c0_i32 = arith.constant 0 : i32
    %c0_i32_0 = arith.constant 0 : i32
    %c0_i32_1 = arith.constant 0 : i32
    return %arg0, %c0_i32, %c0_i32_0 : i32, i32, i32
  }
  func.func @transform_4(%arg0: i32, %arg1: memref<2x64xf32, #tpu.memory_space<smem>>) -> (i32, i32) {
    %c0_i32 = arith.constant 0 : i32
    %c0_i32_0 = arith.constant 0 : i32
    %c0_i32_1 = arith.constant 0 : i32
    return %c0_i32, %c0_i32_0 : i32, i32
  }
  func.func @transform_5(%arg0: i32, %arg1: memref<2x64xf32, #tpu.memory_space<smem>>) -> (i32, i32) {
    %c0_i32 = arith.constant 0 : i32
    %c0_i32_0 = arith.constant 0 : i32
    %c0_i32_1 = arith.constant 0 : i32
    return %c0_i32, %c0_i32_0 : i32, i32
  }
}

</mosaic_0001>

<bundles_post_ra>
// kernel: tpu_custom_call.1
= control target key start
LH: loop header
LB: loop body
LE: loop exit
PB: predicated region body
PF: predicated region fallthrough
CT: control target
= control target key end

     0   :  { %s1540_s0 = inlined_call_operand.vmem [shape: f32[2,64], index: 0, kind: input, shape index: {}]   ;;  %s1541_s1 = inlined_call_operand.vmem [shape: f32[2,32,32], index: 1, kind: input, shape index: {}]   ;;  %s1542_s2 = inlined_call_operand.vmem [shape: f32[2,32,32], index: 2, kind: input, shape index: {}]   ;;  %s1543_s3 = inlined_call_operand.hbm [shape: f32[2,32,32], index: 3, kind: input, shape index: {}]   ;;  %s1544_s4 = inlined_call_operand.vmem [shape: f32[2,39,39], index: 4, kind: input, shape index: {}]   ;;  %s1545_s5 = inlined_call_operand.hbm [shape: f32[1,1], index: 5, kind: output, shape index: {0}]   ;;  %s1546_s6 = inlined_call_operand.hbm [shape: f32[1,1], index: 6, kind: output, shape index: {1}]  }
   0x1   :  { %1547 = sst [smem:[#allocation14_spill]] %s1541_s1  ;;  %s12_s23 = sshll.u32 %s1540_s0, 4  ;;  %s13_s23 = int_to_ptr.vmem [resolvable:$true] %s12_s23 }
   0x2   :  { %1548 = sst [smem:[#allocation15_spill]] %s1542_s2  ;;  %s985_s24 = scalar_lea.vmem %s13_s23, 32 }
   0x3   :  { %1549 = sst [smem:[#allocation16_spill]] %s1543_s3  ;;  %p986_p0 = scmp.ne.s32.totalorder %s13_s23, %s985_s24 }
   0x4   :  { %p990_p1 = scmp.lt.s32.totalorder %s13_s23, %s13_s23  ;;  %p991_p2 = scmp.lt.s32.totalorder %s985_s24, %s985_s24 }
   0x6   :  { %p992_p3 = por %p991_p2, %p990_p1 }
   0x8   :  { %p993_p4 = pnand %p992_p3, %p986_p0 }
   0xa   :  { %996 = shalt.err (!%p993_p4)  }
   0xb   :  { %s1165_s25 = smov [#allocation3]  }
   0xc   :  { %15 = dma.vmem_to_smem %s13_s23, 32, %s1165_s25, [#allocation2] }
   0xd   :  { %1115 = dma.done.wait [#allocation2], 32 }
   0xe   :  { %1116 = vsyncadd [#allocation2], 4294967264 }
   0xf   :  { %17 = sfence }
  0x10   :  { %18 = vsyncpa [#allocation5], 0 }
  0x11   :  { %20 = vsyncpa [#allocation5 + $0x1], 0 }
  0x12   :  { %21 = vsyncpa [#allocation6], 0 }
  0x13   :  { %22 = vsyncpa [#allocation9], 0  ;;  %s1219_s26 = smov 0   ;;  %s1221_s0 = smov 0  }
  0x14   :  { %s1223_s27 = smov 0   ;;  %s1225_s28 = smov 0  }
  0x15 LB: > { %s1238_s29 = sadd.s32 4294967295, %s1143_s28   ;;  %s1241_s30 = sadd.s32 1, %s1143_s28   ;;  %s1143_s28 = sphi %s1225_s28, %s1563_s28   ;;  %s1139_s27 = sphi %s1223_s27, %s1562_s27   ;;  %s1135_s0 = sphi %s1221_s0, %s1561_s0   ;;  %s1131_s26 = sphi %s1219_s26, %s1560_s26  }
  0x16   : > { %s84_s7 = ssub.s32 %s1143_s28, %s1241_s30  ;;  %s87_s8 = sadd.s32 1, %s1139_s27 }
  0x17   : > { %p85_p5 = scmp.eq.s32.totalorder %s84_s7, 0  ;;  %p94_p6 = scmp.ne.s32.totalorder %s1139_s27, %s1135_s0 }
  0x18   : > { %p95_p7 = scmp.eq.s32.totalorder %s1143_s28, 0  ;;  %p100_p8 = scmp.ne.s32.totalorder %s1135_s0, %s1131_s26 }
  0x19   : > { %s1251_s9 = scalar_select %p85_p5, %s1139_s27, %s87_s8  }
  0x1a   : > { %p96_p9 = por %p95_p7, %p94_p6  ;;  %p101_p10 = scmp.eq.s32.totalorder %s1238_s29, 0 }
  0x1b   : > { %p893_p11 = scmp.lt.s32.totalorder %s1143_s28, 2  ;;  %s208_s11 = sand.u32 1, %s1139_s27  }
  0x1c   : > { %p1255_p12 = por %p101_p10, %p100_p8  ;;  %s849_s12 = sshll.u32 %s208_s11, 5 }
  0x1d   : > { %s875_s13 = sshll.u32 %s1143_s28, 9  ;;  %s1551_s3 = sld [smem:[#allocation16_spill]] }
  0x1e   : > { %s212_s17 = scalar_lea.vmem [#allocation4], %s849_s12  ;;  %p1268_p13 = pnand %p893_p11, %p96_p9 }
  0x1f   : > { %s219_s18 = sshll.u32 %s212_s17, 4  ;;  %s1273_s20 = scalar_lea.sflag [#allocation5], %s208_s11  ;;  %s1266_s18 = int_to_ptr.vmem [resolvable:$true] %s219_s18 }
  0x20   : > { %p999_p2 = pneg %p1268_p13 }
  0x23   : > { %s1264_s16 = scalar_lea.hbm %s1551_s3, %s875_s13  ;;  %s1002_s24 = scalar_lea.hbm %s1551_s3, 1024 }
  0x24   : > { %s997_s21 = scalar_lea.hbm %s1264_s16, 512  ;;  %p1003_p5 = scmp.lt.u32.totalorder %s1264_s16, %s1551_s3 }
  0x25   : > { %p998_p1 = scmp.ne.s32.totalorder %s1264_s16, %s997_s21  ;;  %p1004_p6 = scmp.lt.u32.totalorder %s1002_s24, %s997_s21 }
  0x26   : > { %p1006_p8 = scmp.lt.u32.totalorder %s997_s21, %s1264_s16 }
  0x27   : > { %p1000_p3 = pnand %p999_p2, %p998_p1  ;;  %p1005_p7 = por %p1004_p6, %p1003_p5 }
  0x29   : > { %p1001_p4 = pneg %p1000_p3  ;;  %p1007_p9 = por %p1006_p8, %p1005_p7 }
  0x2b   : > { %p1008_p10 = pnand %p1007_p9, %p1001_p4 }
  0x2d   : > { %1011 = shalt.err (!%p1008_p10)
}
  0x2e   : > { %s1012_s7 = scalar_lea.vmem %s1266_s18, 512  ;;  %s1166_s8 = smov [#allocation4]  }
  0x2f   : > { %p1013_p11 = scmp.ne.s32.totalorder %s1266_s18, %s1012_s7  ;;  %s1017_s11 = sshll.u32 %s1166_s8, 4  ;;  %s1018_s11 = int_to_ptr.vmem [resolvable:$false] %s1017_s11 }
  0x30   : > { %s1019_s12 = scalar_lea.vmem %s1018_s11, 1024  ;;  %p1020_p0 = scmp.lt.s32.totalorder %s1266_s18, %s1018_s11 }
  0x31   : > { %p1015_p1 = pnand %p1013_p11, %p999_p2  ;;  %p1021_p5 = scmp.lt.s32.totalorder %s1019_s12, %s1012_s7 }
  0x33   : > { %p1016_p3 = pneg %p1015_p1  ;;  %p1022_p6 = por %p1021_p5, %p1020_p0 }
  0x35   : > { %p1023_p7 = pnand %p1022_p6, %p1016_p3 }
  0x37   : > { %1026 = shalt.err (!%p1023_p7)
}
  0x38   : > { %s1167_s13 = smov 128   ;;  %s1168_s14 = smov 8  }
  0x39   : > { %892 = dma.hbm_to_vmem [thread:$0]  (!%p1268_p13), %s1264_s16, 512, %s1266_s18, %s1273_s20, %s1167_s13, %s1167_s13, %s1168_s14  }
  0x3a   : > { %p235_p2 = scmp.lt.s32.totalorder %s1143_s28, 3  ;;  %p1553_p4 = scmp.ge.s32.totalorder %s1143_s28, 1 }
  0x3c   : > { %p236_p8 = pnand %p1553_p4, %p235_p2 }
  0x3d   : > { %s241_s15 = sand.u32 (!%p236_p8), 1, %s1135_s0  }
  0x3e   : > { %239 = sbr.rel (%p236_p8) target bundleno = 856 (0x358), region = 36  ;;  %s853_s17 = sshll.u32 (!%p236_p8), %s241_s15, 5 }
  0x3f   : > { %s242_s21 = scalar_lea.sflag (!%p236_p8), [#allocation5], %s241_s15  ;;  %s1305_s22 = scalar_lea.vmem (!%p236_p8), [#allocation4], %s853_s17 }
  0x45   : > { %1118 = dma.done.wait (%p1255_p12), %s242_s21, 512  }
  0x46   : > { %1120 = vsyncadd (%p1255_p12), %s242_s21, 4294966784  ;;  %p282_p0 = scmp.lt.s32.totalorder %s1238_s29, 1  ;;  %s1554_s1 = sld [smem:[#allocation14_spill]] }
  0x47   : > { %s1555_s2 = sld [smem:[#allocation15_spill]]  ;;  %p859_p12 = scmp.ne.s32.totalorder %s1238_s29, 0 }
  0x48   : > { %s283_s16 = scalar_select %p282_p0, %s1238_s29, 1 }
  0x49   : > { %300 = sbr.rel (%p859_p12) target bundleno = 80 (0x50), region = 44  ;;  %vm301_vm0 = vcmask (!%p859_p12), 0   ;;  %v1169_v0 = vmov (!%p859_p12), 0.0  }
  0x4a   : > { %s876_s18 = sshll.u32 %s283_s16, 5  ;;  %s878_s28 = smul.u32 40, %s283_s16  ;;  %302 = vst.msk [vmem:[#allocation7] sm:$0x1] (!%p859_p12), %vm301_vm0, %v1169_v0  ;;  %303 = vst.msk [vmem:[#allocation8] sm:$0x1] (!%p859_p12), %vm301_vm0, %v1169_v0 }
  0x4c   : > { %s286_s23 = scalar_lea.vmem %s1554_s1, %s876_s18  ;;  %s1324_s10 = scalar_lea.vmem %s1544_s4, %s878_s28 }
  0x4d   : > { %s1319_s26 = scalar_lea.vmem %s1555_s2, %s876_s18 }
  0x50 PF: > { %v306_v1 = vld [vmem:[%s286_s23 + $0x10] sm:$0xff]  ;;  %v304_v2 = vld [vmem:[%s286_s23] sm:$0xff]  ;;  %s1170_s11 = smov 3   ;;  %v307_v3 = vld [vmem:[%s286_s23 + $0x18] sm:$0xff]  ;;  %s1171_s12 = smov 125   ;;  %vm376_vm1 = vcmask 261120  }
  0x51   : > { %324 = vrot.lane.b32.xlu1 %v306_v1, %s1170_s11  ;;  %320 = vrot.lane.b32.xlu0 %v304_v2, %s1170_s11  ;;  %v305_v4 = vld [vmem:[%s286_s23 + $0x8] sm:$0xff]  ;;  %v1331_v6 = vld [vmem:[%s1305_s22] sm:$0xff]  ;;  %v1353_v54 = vmov 0.0   ;;  %v1355_v55 = vmov 0.0   ;;  %v1357_v56 = vmov 0.0   ;;  %v1359_v57 = vmov 0.0  }
  0x52   : > { %v1328_v5 = vld [vmem:[%s1305_s22 + $0x8] sm:$0xff]  ;;  %v1336_v7 = vld [vmem:[%s1305_s22 + $0x18] sm:$0xff]  ;;  %v1339_v8 = vld [vmem:[%s1305_s22 + $0x10] sm:$0xff]  ;;  %s1361_s13 = smov 0  }
  0x53   : > { %v312_v10 = vld [vmem:[%s1324_s10 + $0x3] sm:$0xff]  ;;  %v315_v12 = vld [vmem:[%s1324_s10 + $0x1b] sm:$0xff]  ;;  %v313_v13 = vld [vmem:[%s1324_s10 + $0xb] sm:$0xff] }
  0x54   : > { %v314_v15 = vld [vmem:[%s1324_s10 + $0x13] sm:$0xff] }
  0x55   : > { %326 = vrot.lane.b32.xlu1 %v307_v3, %s1170_s11  ;;  %322 = vrot.lane.b32.xlu0 %v305_v4, %s1170_s11 }
  0x59   : > { %346 = vrot.lane.b32.xlu1 %v1328_v5, %s1170_s11  ;;  %344 = vrot.lane.b32.xlu0 %v1331_v6, %s1170_s11 }
  0x5d   : > { %350 = vrot.lane.b32.xlu1 %v1336_v7, %s1170_s11  ;;  %348 = vrot.lane.b32.xlu0 %v1339_v8, %s1170_s11 }
  0xc3   : > { %v325_v9 = vpop.permute.xlu1 %324  ;;  %v321_v11 = vpop.permute.xlu0 %320 }
  0xc4   : > { %v332_v14 = vsub.f32 %v312_v10, %v321_v11  ;;  %v334_v20 = vsub.f32 %v314_v15, %v325_v9 }
  0xc6   : > { %v336_v21 = vmul.f32 %v332_v14, %v332_v14  ;;  %v338_v28 = vmul.f32 %v334_v20, %v334_v20 }
  0xc7   : > { %v327_v16 = vpop.permute.xlu1 %326  ;;  %v323_v17 = vpop.permute.xlu0 %322 }
  0xc8   : > { %v335_v18 = vsub.f32 %v315_v12, %v327_v16  ;;  %v333_v19 = vsub.f32 %v313_v13, %v323_v17 }
  0xca   : > { %v337_v22 = vmul.f32 %v333_v19, %v333_v19  ;;  %v339_v25 = vmul.f32 %v335_v18, %v335_v18 }
  0xcb   : > { %v347_v23 = vpop.permute.xlu1 %346  ;;  %v345_v24 = vpop.permute.xlu0 %344 }
  0xcc   : > { %v357_v26 = vmul.f32 %v347_v23, %v337_v22  ;;  %v356_v27 = vmul.f32 %v345_v24, %v336_v21 }
  0xce   : > { %366 = vrot.lane.b32.xlu1 %v357_v26, %s1171_s12  ;;  %364 = vrot.lane.b32.xlu0 %v356_v27, %s1171_s12 }
  0xcf   : > { %v351_v29 = vpop.permute.xlu1 %350  ;;  %v349_v30 = vpop.permute.xlu0 %348 }
  0xd0   : > { %v359_v31 = vmul.f32 %v351_v29, %v339_v25  ;;  %v358_v32 = vmul.f32 %v349_v30, %v338_v28 }
  0xd2   : > { %370 = vrot.lane.b32.xlu1 %v359_v31, %s1171_s12  ;;  %368 = vrot.lane.b32.xlu0 %v358_v32, %s1171_s12 }
 0x140   : > { %v367_v33 = vpop.permute.xlu1 %366  ;;  %v365_v34 = vpop.permute.xlu0 %364 }
 0x141   : > { %v380_v35 = vsel %vm376_vm1, %v367_v33, 0.0  ;;  %v377_v36 = vsel %vm376_vm1, %v365_v34, 0.0 }
 0x142   : > { %381 = vadd.xlane.f32.xlu1 %v380_v35  ;;  %378 = vadd.xlane.f32.xlu0 %v377_v36 }
 0x144   : > { %v369_v37 = vpop.permute.xlu0 %368  ;;  %v371_v39 = vpop.permute.xlu1 %370 }
 0x145   : > { %v383_v38 = vsel %vm376_vm1, %v369_v37, 0.0  ;;  %v386_v40 = vsel %vm376_vm1, %v371_v39, 0.0 }
 0x146   : > { %384 = vadd.xlane.f32.xlu0 %v383_v38 }
 0x14a   : > { %387 = vadd.xlane.f32.xlu0 %v386_v40 }
 0x1cf   : > { %v379_v41 = vpop.xlane.xlu0 %378  ;;  %v382_v42 = vpop.xlane.xlu1 %381 }
 0x1d0   : > { %v389_v44 = vadd.f32 %v382_v42, %v379_v41 }
 0x1d3   : > { %v385_v43 = vpop.xlane.xlu0 %384 }
 0x1d4   : > { %v390_v45 = vadd.f32 %v389_v44, %v385_v43 }
 0x1d7   : > { %v388_v46 = vpop.xlane.xlu0 %387 }
 0x1d8   : > { %v391_v47 = vadd.f32 %v390_v45, %v388_v46 }
 0x1da   : > { %v392_v48 = vrot.slane %v391_v47, 4 }
 0x1dc   : > { %v393_v49 = vadd.f32 %v392_v48, %v391_v47 }
 0x1de   : > { %v394_v50 = vrot.slane %v393_v49, 2 }
 0x1e0   : > { %v395_v51 = vadd.f32 %v394_v50, %v393_v49 }
 0x1e2   : > { %v396_v52 = vrot.slane %v395_v51, 1 }
 0x1e4   : > { %v1351_v53 = vadd.f32 %v396_v52, %v395_v51 }
 0x1e5 LB: >> { %s1379_s14 = sshll.u32 %s1163_s13, 3  ;;  %s417_s15 = scalar_lea.vmem %s1324_s10, %s1163_s13  ;;  %s1163_s13 = sphi %s1361_s13, %s403_s13   ;;  %v1159_v57 = vphi %v1359_v57, %v1559_v57   ;;  %v1155_v56 = vphi %v1357_v56, %v1558_v56   ;;  %v1151_v55 = vphi %v1355_v55, %v1557_v55   ;;  %v1147_v54 = vphi %v1353_v54, %v1556_v54  }
 0x1e6   : >> { %s431_s17 = sadd.s32 1, %s1379_s14  ;;  %s465_s21 = sadd.s32 2, %s1379_s14  ;;  %v1389_v58 = vld [vmem:[%s417_s15 + $0x10] sm:$0xff]  ;;  %v1391_v59 = vld [vmem:[%s417_s15] sm:$0xff]  ;;  %v1394_v61 = vld [vmem:[%s417_s15 + $0x18] sm:$0xff] }
 0x1e7   : >> { %s432_s22 = sshra.s32 %s431_s17, 7  ;;  %s437_s16 = sand.u32 127, %s431_s17  ;;  %v1396_v62 = vld [vmem:[%s417_s15 + $0x8] sm:$0xff] }
 0x1e8   : >> { %s434_s18 = sadd.s32 %s1238_s29, %s432_s22  ;;  %s466_s28 = sshra.s32 %s465_s21, 7 }
 0x1e9   : >> { %s862_s19 = sshll.u32 %s434_s18, 7  ;;  %s468_s20 = sadd.s32 %s1238_s29, %s466_s28 }
 0x1ea   : >> { %s438_s23 = sadd.s32 %s862_s19, %s437_s16  ;;  %s863_s24 = sshll.u32 %s468_s20, 7 }
 0x1eb   : >> { %s439_s25 = sld [smem:[#allocation3 + %s438_s23]]  ;;  %s471_s7 = sand.u32 127, %s465_s21 }
 0x1ec   : >> { %s472_s8 = sadd.s32 %s863_s24, %s471_s7  ;;  %s499_s11 = sadd.s32 3, %s1379_s14 }
 0x1ed   : >> { %s473_s12 = sld [smem:[#allocation3 + %s472_s8]]  ;;  %s500_s1 = sshra.s32 %s499_s11, 7 }
 0x1ee   : >> { %s502_s2 = sadd.s32 %s1238_s29, %s500_s1  ;;  %s505_s22 = sand.u32 127, %s499_s11 }
 0x1ef   : >> { %s864_s17 = sshll.u32 %s502_s2, 7  ;;  %s533_s3 = sadd.s32 4, %s1379_s14 }
 0x1f0   : >> { %s534_s21 = sshra.s32 %s533_s3, 7  ;;  %s506_s16 = sadd.s32 %s864_s17, %s505_s22 }
 0x1f1   : >> { %v440_v60 = vstv %s439_s25  ;;  %s536_s1 = sadd.s32 %s1238_s29, %s534_s21  ;;  %s1172_s18 = smov 127  }
 0x1f2   : >> { %v443_v63 = vmul.f32 %v440_v60, %v1389_v58  ;;  %v441_v0 = vmul.f32 %v440_v60, %v1391_v59  ;;  %v444_v1 = vmul.f32 %v440_v60, %v1394_v61  ;;  %v442_v2 = vmul.f32 %v440_v60, %v1396_v62  ;;  %s567_s2 = sadd.s32 5, %s1379_s14  ;;  %s507_s28 = sld [smem:[#allocation3 + %s506_s16]] }
 0x1f3   : >> { %v474_v3 = vstv %s473_s12  ;;  %s865_s15 = sshll.u32 %s536_s1, 7  ;;  %s539_s19 = sand.u32 127, %s533_s3 }
 0x1f4   : >> { %453 = vrot.lane.b32.xlu1 %v443_v63, %s1172_s18  ;;  %449 = vrot.lane.b32.xlu0 %v441_v0, %s1172_s18  ;;  %s568_s20 = sshra.s32 %s567_s2, 7  ;;  %v476_v4 = vmul.f32 %v474_v3, %v1396_v62  ;;  %v475_v9 = vmul.f32 %v474_v3, %v1391_v59  ;;  %s540_s23 = sadd.s32 %s865_s15, %s539_s19  ;;  %v478_v10 = vmul.f32 %v474_v3, %v1394_v61 }
 0x1f5   : >> { %s570_s24 = sadd.s32 %s1238_s29, %s568_s20  ;;  %s1173_s25 = smov 126   ;;  %v477_v11 = vmul.f32 %v474_v3, %v1389_v58 }
 0x1f6   : >> { %s541_s3 = sld [smem:[#allocation3 + %s540_s23]]  ;;  %s866_s7 = sshll.u32 %s570_s24, 7 }
 0x1f7   : >> { %s573_s8 = sand.u32 127, %s567_s2  ;;  %s601_s11 = sadd.s32 6, %s1379_s14 }
 0x1f8   : >> { %455 = vrot.lane.b32.xlu1 %v444_v1, %s1172_s18  ;;  %451 = vrot.lane.b32.xlu0 %v442_v2, %s1172_s18  ;;  %v508_v12 = vstv %s507_s28  ;;  %s574_s12 = sadd.s32 %s866_s7, %s573_s8  ;;  %s409_s17 = sshra.s32 %s1379_s14, 7 }
 0x1f9   : >> { %v510_v13 = vmul.f32 %v508_v12, %v1396_v62  ;;  %v509_v14 = vmul.f32 %v508_v12, %v1391_v59  ;;  %s602_s22 = sshra.s32 %s601_s11, 7  ;;  %s411_s21 = sadd.s32 %s1238_s29, %s409_s17  ;;  %v512_v15 = vmul.f32 %v508_v12, %v1394_v61  ;;  %v511_v16 = vmul.f32 %v508_v12, %v1389_v58 }
 0x1fa   : >> { %s861_s16 = sshll.u32 %s411_s21, 7  ;;  %s414_s1 = sand.u32 127, %s1379_s14 }
 0x1fb   : >> { %s415_s18 = sadd.s32 %s861_s16, %s414_s1  ;;  %s1174_s15 = smov 125  }
 0x1fc   : >> { %485 = vrot.lane.b32.xlu1 %v476_v4, %s1173_s25  ;;  %483 = vrot.lane.b32.xlu0 %v475_v9, %s1173_s25  ;;  %s604_s2 = sadd.s32 %s1238_s29, %s602_s22  ;;  %s416_s28 = sld [smem:[#allocation3 + %s415_s18]]  ;;  %v542_v17 = vstv %s541_s3 }
 0x1fd   : >> { %s575_s19 = sld [smem:[#allocation3 + %s574_s12]]  ;;  %s635_s20 = sadd.s32 7, %s1379_s14  ;;  %v544_v18 = vmul.f32 %v542_v17, %v1396_v62  ;;  %v543_v19 = vmul.f32 %v542_v17, %v1391_v59  ;;  %v546_v25 = vmul.f32 %v542_v17, %v1394_v61  ;;  %v545_v26 = vmul.f32 %v542_v17, %v1389_v58 }
 0x1fe   : >> { %s867_s23 = sshll.u32 %s604_s2, 7  ;;  %s607_s24 = sand.u32 127, %s601_s11 }
 0x1ff   : >> { %s608_s7 = sadd.s32 %s867_s23, %s607_s24  ;;  %s1175_s14 = smov 124  }
 0x200   : >> { %489 = vrot.lane.b32.xlu1 %v478_v10, %s1173_s25  ;;  %487 = vrot.lane.b32.xlu0 %v477_v11, %s1173_s25  ;;  %s636_s25 = sshra.s32 %s635_s20, 7  ;;  %s609_s8 = sld [smem:[#allocation3 + %s608_s7]] }
 0x201   : >> { %s638_s3 = sadd.s32 %s1238_s29, %s636_s25  ;;  %s641_s12 = sand.u32 127, %s635_s20 }
 0x202   : >> { %v422_v20 = vstv %s416_s28  ;;  %s868_s11 = sshll.u32 %s638_s3, 7  ;;  %s1176_s22 = smov 123  }
 0x203   : >> { %v1422_v21 = vmul.f32 %v422_v20, %v1389_v58  ;;  %v1425_v22 = vmul.f32 %v422_v20, %v1391_v59  ;;  %v1428_v23 = vmul.f32 %v422_v20, %v1394_v61  ;;  %v1431_v24 = vmul.f32 %v422_v20, %v1396_v62  ;;  %s642_s17 = sadd.s32 %s868_s11, %s641_s12  ;;  %s1177_s16 = smov 122  }
 0x204   : >> { %519 = vrot.lane.b32.xlu1 %v510_v13, %s1174_s15  ;;  %517 = vrot.lane.b32.xlu0 %v509_v14, %s1174_s15  ;;  %v576_v27 = vstv %s575_s19  ;;  %s643_s21 = sld [smem:[#allocation3 + %s642_s17]]  ;;  %s1178_s1 = smov 121  }
 0x205   : >> { %v578_v28 = vmul.f32 %v576_v27, %v1396_v62  ;;  %v577_v29 = vmul.f32 %v576_v27, %v1391_v59  ;;  %v580_v30 = vmul.f32 %v576_v27, %v1394_v61  ;;  %v579_v31 = vmul.f32 %v576_v27, %v1389_v58  ;;  %s403_s13 = sadd.s32 1, %s1163_s13  }
 0x206   : >> { %v610_v32 = vstv %s609_s8  ;;  %v427_v1 = vadd.f32 %v1159_v57, %v1425_v22  ;;  %v428_v2 = vadd.f32 %v1155_v56, %v1431_v24  ;;  %v429_v9 = vadd.f32 %v1151_v55, %v1422_v21  ;;  %p400_p13 = scmp.ge.s32.totalorder %s403_s13, 8  }
 0x207   : >> { %v612_v33 = vmul.f32 %v610_v32, %v1396_v62  ;;  %v611_v34 = vmul.f32 %v610_v32, %v1391_v59  ;;  %v614_v35 = vmul.f32 %v610_v32, %v1394_v61  ;;  %v613_v36 = vmul.f32 %v610_v32, %v1389_v58  ;;  %p894_p9 = scmp.eq.s32.totalorder (%p400_p13), %s1238_s29, 1 }
 0x208   : >> { %523 = vrot.lane.b32.xlu1 %v512_v15, %s1174_s15  ;;  %521 = vrot.lane.b32.xlu0 %v511_v16, %s1174_s15  ;;  %v430_v11 = vadd.f32 %v1147_v54, %v1428_v23  ;;  %vm708_vm2 = vcmask (%p400_p13), 0  }
 0x20a   : >> { %v644_v37 = vstv %s643_s21 }
 0x20b   : >> { %v646_v38 = vmul.f32 %v644_v37, %v1396_v62  ;;  %v645_v39 = vmul.f32 %v644_v37, %v1391_v59  ;;  %v648_v40 = vmul.f32 %v644_v37, %v1394_v61  ;;  %v647_v41 = vmul.f32 %v644_v37, %v1389_v58 }
 0x20c   : >> { %553 = vrot.lane.b32.xlu1 %v544_v18, %s1175_s14  ;;  %551 = vrot.lane.b32.xlu0 %v543_v19, %s1175_s14 }
 0x210   : >> { %557 = vrot.lane.b32.xlu1 %v546_v25, %s1175_s14  ;;  %555 = vrot.lane.b32.xlu0 %v545_v26, %s1175_s14 }
 0x214   : >> { %587 = vrot.lane.b32.xlu1 %v578_v28, %s1176_s22  ;;  %585 = vrot.lane.b32.xlu0 %v577_v29, %s1176_s22 }
 0x218   : >> { %591 = vrot.lane.b32.xlu1 %v580_v30, %s1176_s22  ;;  %589 = vrot.lane.b32.xlu0 %v579_v31, %s1176_s22 }
 0x21c   : >> { %621 = vrot.lane.b32.xlu1 %v612_v33, %s1177_s16  ;;  %619 = vrot.lane.b32.xlu0 %v611_v34, %s1177_s16 }
 0x220   : >> { %625 = vrot.lane.b32.xlu1 %v614_v35, %s1177_s16  ;;  %623 = vrot.lane.b32.xlu0 %v613_v36, %s1177_s16 }
 0x224   : >> { %655 = vrot.lane.b32.xlu1 %v646_v38, %s1178_s1  ;;  %653 = vrot.lane.b32.xlu0 %v645_v39, %s1178_s1 }
 0x228   : >> { %659 = vrot.lane.b32.xlu1 %v648_v40, %s1178_s1  ;;  %657 = vrot.lane.b32.xlu0 %v647_v41, %s1178_s1 }
 0x266   : >> { %v454_v42 = vpop.permute.xlu1 %453  ;;  %v450_v43 = vpop.permute.xlu0 %449 }
 0x267   : >> { %v461_v10 = vadd.f32 %v450_v43, %v427_v1  ;;  %v463_v17 = vadd.f32 %v454_v42, %v429_v9  ;;  %v669_v43 = vld [vmem:[%s1319_s26] sm:$0xff] (%p400_p13) }
 0x26a   : >> { %v456_v44 = vpop.permute.xlu1 %455  ;;  %v452_v45 = vpop.permute.xlu0 %451 }
 0x26b   : >> { %v462_v12 = vadd.f32 %v452_v45, %v428_v2  ;;  %v464_v18 = vadd.f32 %v456_v44, %v430_v11  ;;  %v671_v44 = vld [vmem:[%s1319_s26 + $0x10] sm:$0xff] (%p400_p13)  ;;  %v670_v45 = vld [vmem:[%s1319_s26 + $0x8] sm:$0xff] (%p400_p13) }
 0x26e   : >> { %v486_v46 = vpop.permute.xlu1 %485  ;;  %v484_v47 = vpop.permute.xlu0 %483 }
 0x26f   : >> { %v496_v13 = vadd.f32 %v486_v46, %v462_v12  ;;  %v495_v14 = vadd.f32 %v484_v47, %v461_v10 }
 0x272   : >> { %v490_v48 = vpop.permute.xlu1 %489  ;;  %v488_v49 = vpop.permute.xlu0 %487 }
 0x273   : >> { %v498_v20 = vadd.f32 %v490_v48, %v464_v18  ;;  %v497_v56 = vadd.f32 %v488_v49, %v463_v17  ;;  %v672_v49 = vld [vmem:[%s1319_s26 + $0x18] sm:$0xff] (%p400_p13)  ;;  %s1179_s26 = smov (%p400_p13), [#allocation7]  }
 0x274   : > { %s720_s10 = sshll.u32 (%p400_p13), %s1179_s26, 4  ;;  %s721_s10 = int_to_ptr.vmem [resolvable:$true] %s720_s10 }
 0x275   : > { %s1027_s13 = scalar_lea.vmem (%p400_p13), %s721_s10, 16  ;;  %s1033_s18 = scalar_lea.vmem (%p400_p13), %s721_s10, 32 }
 0x276   : >> { %v520_v50 = vpop.permute.xlu1 %519  ;;  %v518_v51 = vpop.permute.xlu0 %517  ;;  %p1028_p10 = scmp.ne.s32.totalorder (%p400_p13), %s721_s10, %s1027_s13  ;;  %p1034_p3 = scmp.lt.s32.totalorder (%p400_p13), %s721_s10, %s721_s10 }
 0x277   : >> { %v530_v57 = vadd.f32 %v520_v50, %v496_v13  ;;  %v529_v19 = vadd.f32 %v518_v51, %v495_v14  ;;  %p1035_p5 = scmp.lt.s32.totalorder (%p400_p13), %s1033_s18, %s1027_s13 }
 0x278   : > { %p1029_p11 = pnand (%p400_p13), %p1028_p10, %p894_p9 }
 0x279   : > { %p1036_p6 = por (%p400_p13), %p1035_p5, %p1034_p3 }
 0x27a   : >> { %v524_v52 = vpop.permute.xlu1 %523  ;;  %v522_v59 = vpop.permute.xlu0 %521  ;;  %p1030_p1 = pneg (%p400_p13), %p1029_p11 }
 0x27b   : >> { %v532_v55 = vadd.f32 %v524_v52, %v498_v20  ;;  %v531_v21 = vadd.f32 %v522_v59, %v497_v56 }
 0x27c   : > { %p1037_p7 = pnand (%p400_p13), %p1036_p6, %p1030_p1 }
 0x27e   : >> { %v554_v60 = vpop.permute.xlu1 %553  ;;  %v552_v62 = vpop.permute.xlu0 %551 }
 0x27f   : >> { %v564_v22 = vadd.f32 %v554_v60, %v530_v57  ;;  %v563_v24 = vadd.f32 %v552_v62, %v529_v19 }
 0x282   : >> { %v558_v63 = vpop.permute.xlu1 %557  ;;  %v556_v61 = vpop.permute.xlu0 %555 }
 0x283   : >> { %v566_v54 = vadd.f32 %v558_v63, %v532_v55  ;;  %v565_v23 = vadd.f32 %v556_v61, %v531_v21 }
 0x286   : >> { %v588_v0 = vpop.permute.xlu1 %587  ;;  %v586_v58 = vpop.permute.xlu0 %585 }
 0x287   : >> { %v598_v27 = vadd.f32 %v588_v0, %v564_v22  ;;  %v597_v28 = vadd.f32 %v586_v58, %v563_v24 }
 0x28a   : >> { %v592_v3 = vpop.permute.xlu1 %591  ;;  %v590_v4 = vpop.permute.xlu0 %589 }
 0x28b   : >> { %v600_v33 = vadd.f32 %v592_v3, %v566_v54  ;;  %v599_v34 = vadd.f32 %v590_v4, %v565_v23 }
 0x28e   : >> { %v622_v15 = vpop.permute.xlu1 %621  ;;  %v620_v16 = vpop.permute.xlu0 %619 }
 0x28f   : >> { %v632_v29 = vadd.f32 %v622_v15, %v598_v27  ;;  %v631_v30 = vadd.f32 %v620_v16, %v597_v28 }
 0x292   : >> { %v626_v25 = vpop.permute.xlu1 %625  ;;  %v624_v26 = vpop.permute.xlu0 %623 }
 0x293   : >> { %v634_v37 = vadd.f32 %v626_v25, %v600_v33  ;;  %v633_v38 = vadd.f32 %v624_v26, %v599_v34 }
 0x296   : >> { %v656_v31 = vpop.permute.xlu1 %655  ;;  %v654_v32 = vpop.permute.xlu0 %653 }
 0x297   : >> { %v666_v35 = vadd.f32 %v656_v31, %v632_v29   ;;  %v665_v36 = vadd.f32 %v654_v32, %v631_v30   ;;  %402 = sbr.rel (!%p400_p13) target bundleno = 485 (0x1e5), region = 102 }
 0x299   : >> { %v1558_v56 = vmov %v666_v35  ;;  %v1559_v57 = vmov %v665_v36  ;;  %v673_v46 = vsub.f32 (%p400_p13), %v665_v36, %v669_v43  ;;  %v674_v48 = vsub.f32 (%p400_p13), %v666_v35, %v670_v45 }
 0x29a   : >> { %v660_v39 = vpop.permute.xlu1 %659  ;;  %v658_v40 = vpop.permute.xlu0 %657 }
 0x29b   : >> { %v668_v41 = vadd.f32 %v660_v39, %v634_v37   ;;  %v667_v42 = vadd.f32 %v658_v40, %v633_v38   ;;  %v677_v51 = vmul.f32 (%p400_p13), %v673_v46, %v673_v46  ;;  %v678_v59 = vmul.f32 (%p400_p13), %v674_v48, %v674_v48 }
 0x29d   : >> { %v1556_v54 = vmov %v668_v41  ;;  %v1557_v55 = vmov %v667_v42  ;;  %v675_v47 = vsub.f32 (%p400_p13), %v667_v42, %v671_v44  ;;  %v676_v50 = vsub.f32 (%p400_p13), %v668_v41, %v672_v49 }
 0x29e   : > { %v681_v62 = vmul.f32 %v677_v51, %v1331_v6  ;;  %v682_v61 = vmul.f32 %v678_v59, %v1328_v5  ;;  %v706_v6 = vld [vmem:[#allocation7] sm:$0x1] }
 0x29f   : > { %v679_v52 = vmul.f32 %v675_v47, %v675_v47  ;;  %v680_v60 = vmul.f32 %v676_v50, %v676_v50  ;;  %v707_v5 = vadd.f32 %v706_v6, %v1351_v53 }
 0x2a0   : > { %v685_v58 = vsel %vm376_vm1, %v681_v62, 0.0  ;;  %v688_v2 = vsel %vm376_vm1, %v682_v61, 0.0 }
 0x2a1   : > { %v683_v63 = vmul.f32 %v679_v52, %v1339_v8  ;;  %v684_v0 = vmul.f32 %v680_v60, %v1336_v7  ;;  %686 = vadd.xlane.f32.xlu0 %v685_v58  ;;  %709 = vst.msk [vmem:[#allocation7] sm:$0x1] %vm708_vm2, %v707_v5 }
 0x2a3   : > { %v691_v1 = vsel %vm376_vm1, %v683_v63, 0.0  ;;  %v694_v3 = vsel %vm376_vm1, %v684_v0, 0.0 }
 0x2a4   : > { %692 = vadd.xlane.f32.xlu1 %v691_v1 }
 0x2a5   : > { %689 = vadd.xlane.f32.xlu0 %v688_v2 }
 0x2a8   : > { %695 = vadd.xlane.f32.xlu1 %v694_v3 }
 0x2a9   : > { %1040 = shalt.err (!%p1037_p7)
}
 0x2aa   : > { %s1041_s28 = scalar_lea.hbm %s1545_s5, 16 }
 0x2ab   : > { %p1042_p2 = scmp.ne.s32.totalorder %s1545_s5, %s1041_s28  ;;  %p1047_p0 = scmp.lt.u32.totalorder %s1041_s28, %s1545_s5 }
 0x2ad   : > { %p1043_p4 = pnand %p1042_p2, %p894_p9 }
 0x2af   : > { %p1044_p8 = pneg %p1043_p4 }
 0x2b1   : > { %p1049_p12 = pnand %p1047_p0, %p1044_p8 }
 0x2b3   : > { %1052 = shalt.err (!%p1049_p12)
}
 0x2b4   : > { %882 = dma.vmem_to_hbm [thread:$0]  (%p894_p9), %s721_s10, 16, %s1545_s5, [#allocation6]   ;;  %v710_v17 = vld [vmem:[#allocation8] sm:$0x1] }
 0x2b5   : > { %s1180_s14 = smov [#allocation8]  }
 0x2b6   : > { %s731_s3 = sshll.u32 %s1180_s14, 4  ;;  %s732_s3 = int_to_ptr.vmem [resolvable:$true] %s731_s3 }
 0x2b7   : > { %s1053_s8 = scalar_lea.vmem %s732_s3, 16  ;;  %s1059_s11 = scalar_lea.vmem %s732_s3, 32 }
 0x2b8   : > { %p1054_p13 = scmp.ne.s32.totalorder %s732_s3, %s1053_s8  ;;  %p1060_p1 = scmp.lt.s32.totalorder %s732_s3, %s732_s3 }
 0x2b9   : > { %p1061_p3 = scmp.lt.s32.totalorder %s1059_s11, %s1053_s8 }
 0x2ba   : > { %p1055_p10 = pnand %p1054_p13, %p894_p9 }
 0x2bb   : > { %p1062_p5 = por %p1061_p3, %p1060_p1 }
 0x2bc   : > { %p1056_p11 = pneg %p1055_p10 }
 0x2be   : > { %p1063_p6 = pnand %p1062_p5, %p1056_p11 }
 0x32e   : > { %v687_v7 = vpop.xlane.xlu0 %686 }
 0x331   : > { %v693_v8 = vpop.xlane.xlu1 %692 }
 0x332   : > { %v690_v53 = vpop.xlane.xlu0 %689 }
 0x333   : > { %v697_v4 = vadd.f32 %v690_v53, %v687_v7 }
 0x335   : > { %v696_v9 = vpop.xlane.xlu1 %695  ;;  %v698_v10 = vadd.f32 %v697_v4, %v693_v8 }
 0x337   : > { %v699_v11 = vadd.f32 %v698_v10, %v696_v9 }
 0x339   : > { %v700_v12 = vrot.slane %v699_v11, 4 }
 0x33b   : > { %v701_v13 = vadd.f32 %v700_v12, %v699_v11 }
 0x33d   : > { %v702_v14 = vrot.slane %v701_v13, 2 }
 0x33f   : > { %v703_v15 = vadd.f32 %v702_v14, %v701_v13 }
 0x341   : > { %v704_v16 = vrot.slane %v703_v15, 1 }
 0x343   : > { %v705_v18 = vadd.f32 %v704_v16, %v703_v15 }
 0x345   : > { %v711_v57 = vadd.f32 %v710_v17, %v705_v18 }
 0x347   : > { %712 = vst.msk [vmem:[#allocation8] sm:$0x1] %vm708_vm2, %v711_v57 }
 0x348   : > { %1066 = shalt.err (!%p1063_p6)
}
 0x349   : > { %s1067_s22 = scalar_lea.hbm %s1546_s6, 16 }
 0x34a   : > { %p1068_p7 = scmp.ne.s32.totalorder %s1546_s6, %s1067_s22  ;;  %p1073_p8 = scmp.lt.u32.totalorder %s1067_s22, %s1546_s6 }
 0x34c   : > { %p1069_p2 = pnand %p1068_p7, %p894_p9 }
 0x34e   : > { %p1070_p4 = pneg %p1069_p2 }
 0x350   : > { %p1075_p0 = pnand %p1073_p8, %p1070_p4 }
 0x352   : > { %1078 = shalt.err (!%p1075_p0)
}
 0x353   : > { %884 = dma.vmem_to_hbm [thread:$0]  (%p894_p9), %s732_s3, 16, %s1546_s6, [#allocation9]  }
 0x354   : > { %1122 = dma.done.wait (%p894_p9), [#allocation6], 16  }
 0x355   : > { %1124 = vsyncadd (%p894_p9), [#allocation6], 4294967280 }
 0x356   : > { %1126 = dma.done.wait (%p894_p9), [#allocation9], 16  }
 0x357   : > { %1128 = vsyncadd (%p894_p9), [#allocation9], 4294967280 }
 0x358 PF: > { %p25_p12 = scmp.ge.s32.totalorder %s1241_s30, 4   ;;  %s1560_s26 = smov %s1135_s0 }
 0x359   : > { %s1561_s0 = smov %s1139_s27  ;;  %s1562_s27 = smov %s1251_s9 }
 0x35a   : > { %s1563_s28 = smov %s1241_s30  ;;  %27 = sbr.rel (!%p25_p12) target bundleno = 21 (0x15), region = 113 }
 0x361   :  { %748 = vsyncpa [#allocation5], 1 }
 0x362   :  { %750 = vsyncpa [#allocation5 + $0x1], 1 }
 0x363   :  { %751 = vsyncpa [#allocation6], 1 }
 0x364   :  { %753 = vsyncpa [#allocation6 + $0x1], 1 }
 0x365   :  { %754 = vsyncpa [#allocation9], 1 }

</bundles_post_ra>
